<compile_context>
chip_gen: v5e
topology: v5e:2x2
jax: 0.10.0
libtpu: 0.0.40
codegen_flags: <defaults>
</compile_context>

<pallas_src>
import jax
import jax.numpy as jnp
from jax import lax
from jax.experimental import pallas as pl
from jax.experimental.pallas import tpu as pltpu


def clf_loss_kernel(x_ref, w_ref, b_ref, lab_ref, out_ref):
    # logits = x @ W + b : bf16 operands on the MXU, f32 accumulation,
    # bias (already f32, padded classes = -1e30) added in f32.
    logits = jnp.dot(
        x_ref[...], w_ref[...], preferred_element_type=jnp.float32
    ) + b_ref[...]

    # Numerically stable logsumexp over the lane-padded class axis.
    m = jnp.max(logits, axis=-1, keepdims=True)
    lse = m + jnp.log(jnp.sum(jnp.exp(logits - m), axis=-1, keepdims=True))

    # True-class logit via a one-hot mask built from an iota.
    # Padded rows have label -1 -> all-zero mask -> masked out below.
    lab = lab_ref[...]                                            # (TB, 1) int32
    class_ids = lax.broadcasted_iota(jnp.int32, logits.shape, 1)  # (TB, Cp)
    onehot = (class_ids == lab).astype(jnp.float32)
    true_logit = jnp.sum(logits * onehot, axis=-1, keepdims=True)

    valid = (lab >= 0).astype(jnp.float32)                        # (TB, 1)
    partial = jnp.sum((lse - true_logit) * valid)                 # scalar f32

    # Lane-dense (1, 1, 128) partial-sum block; wrapper reads lane 0.
    out_ref[...] = jnp.broadcast_to(partial, (1, 1, 128))


def _round_up(x, m):
    return (x + m - 1) // m * m


def clf_loss(x, w, b, labels, *, tile_b=256):
    """x: (B,H) f32, w: (H,C) f32, b: (C,) f32, labels: (B,) int -> scalar loss."""
    B, H = x.shape
    C = w.shape[1]

    # Lane-dense class dimension.
    Cp = _round_up(C, 128)
    # Batch tiling (TB multiple of 8); pad B up to a whole number of tiles.
    TB = min(tile_b, _round_up(B, 8))
    Bp = _round_up(B, TB)
    num_tiles = Bp // TB

    # bf16 matmul operands (halves HBM traffic, native MXU path); padded rows
    # are zero.  Bias stays f32; padded classes get -1e30 so exp() kills them.
    x_p = jnp.zeros((Bp, H), jnp.bfloat16).at[:B].set(x.astype(jnp.bfloat16))
    w_p = jnp.zeros((H, Cp), jnp.bfloat16).at[:, :C].set(w.astype(jnp.bfloat16))
    b_p = jnp.full((1, Cp), -1e30, jnp.float32).at[0, :C].set(b.astype(jnp.float32))
    # TODO(synk): labels stay in a small (TB,1) VMEM block; an SMEM scalar-prefetch
    # path would need a scalar gather and is not worth it at these sizes.
    lab_p = jnp.full((Bp, 1), -1, jnp.int32).at[:B, 0].set(labels.astype(jnp.int32))

    partials = pl.pallas_call(
        clf_loss_kernel,
        out_shape=jax.ShapeDtypeStruct((num_tiles, 1, 128), jnp.float32),
        grid=(num_tiles,),
        in_specs=[
            pl.BlockSpec((TB, H), lambda i: (i, 0)),   # x tile (pipelined)
            pl.BlockSpec((H, Cp), lambda i: (0, 0)),   # W resident
            pl.BlockSpec((1, Cp), lambda i: (0, 0)),   # bias resident
            pl.BlockSpec((TB, 1), lambda i: (i, 0)),   # labels tile
        ],
        out_specs=pl.BlockSpec((1, 1, 128), lambda i: (i, 0, 0)),
        compiler_params=pltpu.CompilerParams(
            dimension_semantics=("parallel",)),
    )(x_p, w_p, b_p, lab_p)

    # Final tiny reduction in XLA; mean over the real batch.
    # TODO(synk): nn.CrossEntropyLoss's ignore_index=-100 / mean-over-valid is not
    # reproduced (the module never uses it); all real labels are assumed valid.
    return jnp.sum(partials[:, 0, 0]) / B


if __name__ == "__main__":
    # Small, module-consistent shapes: batch=8, hidden=32, num_classes=16.
    # TODO(synk): the SentenceTransformer encoder body is not reproduced; only
    # the classifier-logits matmul + cross-entropy (ClfLoss.forward hot path).
    B, H, C = 8, 32, 16
    key = jax.random.PRNGKey(0)
    kx, kw, kb, kl = jax.random.split(key, 4)

    x = jax.random.normal(kx, (B, H), dtype=jnp.float32)
    w = jax.random.normal(kw, (H, C), dtype=jnp.float32) * 0.05
    b = jax.random.normal(kb, (C,), dtype=jnp.float32) * 0.01
    labels = jax.random.randint(kl, (B,), 0, C, dtype=jnp.int32)

    def ref_loss(x, w, b, labels):
        logits = jnp.dot(x.astype(jnp.bfloat16), w.astype(jnp.bfloat16),
                         preferred_element_type=jnp.float32) + b
        return jnp.mean(
            jax.nn.logsumexp(logits, axis=-1)
            - jnp.take_along_axis(logits, labels[:, None], axis=-1)[:, 0])

    # Single-tile case.
    loss = clf_loss(x, w, b, labels)
    jax.block_until_ready(loss)
    ref = ref_loss(x, w, b, labels)
    assert jnp.allclose(loss, ref, atol=1e-3, rtol=1e-3), (loss, ref)

    # Multi-tile case (exercises batch padding, masking and partial sums).
    B2 = 20
    x2 = jax.random.normal(kx, (B2, H), dtype=jnp.float32)
    labels2 = jax.random.randint(kl, (B2,), 0, C, dtype=jnp.int32)
    loss2 = clf_loss(x2, w, b, labels2, tile_b=8)
    jax.block_until_ready(loss2)
    ref2 = ref_loss(x2, w, b, labels2)
    assert jnp.allclose(loss2, ref2, atol=1e-3, rtol=1e-3), (loss2, ref2)

    print("KERNEL_OK")
</pallas_src>

<mosaic_0001>
module attributes {stable_mosaic.version = 11 : i64} {
  func.func @clf_loss_kernel(%arg0: i32, %arg1: memref<8x32xbf16, #tpu.memory_space<vmem>>, %arg2: memref<32x128xbf16, #tpu.memory_space<vmem>>, %arg3: memref<1x128xf32, #tpu.memory_space<vmem>>, %arg4: memref<8x1xi32, #tpu.memory_space<vmem>>, %arg5: memref<1x1x128xf32, #tpu.memory_space<vmem>>) attributes {dimension_semantics = [#tpu.dimension_semantics<parallel>], iteration_bounds = array<i64: 1>, scalar_prefetch = 0 : i64, scratch_operands = 0 : i64, tpu.core_type = #tpu.core_type<tc>, window_params = [{transform_indices = @transform_0, window_bounds = array<i64: 8, 32>}, {pipeline_mode = #tpu.pipeline_mode<synchronous>, transform_indices = @transform_1, window_bounds = array<i64: 32, 128>}, {pipeline_mode = #tpu.pipeline_mode<synchronous>, transform_indices = @transform_2, window_bounds = array<i64: 1, 128>}, {transform_indices = @transform_3, window_bounds = array<i64: 8, 1>}, {transform_indices = @transform_4, window_bounds = array<i64: 1, 1, 128>}]} {
    %c0 = arith.constant 0 : index
    %c0_0 = arith.constant 0 : index
    %0 = vector.load %arg1[%c0, %c0_0] : memref<8x32xbf16, #tpu.memory_space<vmem>>, vector<8x32xbf16>
    %c0_1 = arith.constant 0 : index
    %c0_2 = arith.constant 0 : index
    %1 = vector.load %arg2[%c0_1, %c0_2] : memref<32x128xbf16, #tpu.memory_space<vmem>>, vector<32x128xbf16>
    %cst = arith.constant dense<0.000000e+00> : vector<8x128xf32>
    %2 = tpu.matmul %0, %1, %cst {dimension_numbers = #tpu.dot_dimension_numbers<[1], [0], [0], [1], [0, 0, 1, 1], [], []>} : vector<8x32xbf16>, vector<32x128xbf16>, vector<8x128xf32> -> vector<8x128xf32>
    %c0_3 = arith.constant 0 : index
    %c0_4 = arith.constant 0 : index
    %3 = vector.load %arg3[%c0_3, %c0_4] : memref<1x128xf32, #tpu.memory_space<vmem>>, vector<1x128xf32>
    %4 = vector.broadcast %3 : vector<1x128xf32> to vector<8x128xf32>
    %5 = arith.addf %2, %4 : vector<8x128xf32>
    %cst_5 = arith.constant dense<0xFF800000> : vector<8xf32>
    %6 = vector.multi_reduction <maximumf>, %5, %cst_5 [1] : vector<8x128xf32> to vector<8xf32>
    %7 = vector.shape_cast %6 : vector<8xf32> to vector<8x1xf32>
    %8 = vector.broadcast %7 : vector<8x1xf32> to vector<8x128xf32>
    %9 = arith.subf %5, %8 : vector<8x128xf32>
    %10 = math.exp %9 : vector<8x128xf32>
    %cst_6 = arith.constant dense<0.000000e+00> : vector<8xf32>
    %11 = vector.multi_reduction <add>, %10, %cst_6 [1] : vector<8x128xf32> to vector<8xf32>
    %12 = vector.shape_cast %11 : vector<8xf32> to vector<8x1xf32>
    %13 = math.log %12 : vector<8x1xf32>
    %14 = arith.addf %7, %13 : vector<8x1xf32>
    %c0_7 = arith.constant 0 : index
    %c0_8 = arith.constant 0 : index
    %15 = vector.load %arg4[%c0_7, %c0_8] : memref<8x1xi32, #tpu.memory_space<vmem>>, vector<8x1xi32>
    %16 = tpu.iota {dimensions = array<i32: 1>} : vector<8x128xi32>
    %17 = vector.broadcast %15 : vector<8x1xi32> to vector<8x128xi32>
    %18 = arith.cmpi eq, %16, %17 : vector<8x128xi32>
    %19 = arith.extui %18 : vector<8x128xi1> to vector<8x128xi32>
    %20 = arith.sitofp %19 : vector<8x128xi32> to vector<8x128xf32>
    %21 = arith.mulf %5, %20 : vector<8x128xf32>
    %cst_9 = arith.constant dense<0.000000e+00> : vector<8xf32>
    %22 = vector.multi_reduction <add>, %21, %cst_9 [1] : vector<8x128xf32> to vector<8xf32>
    %23 = vector.shape_cast %22 : vector<8xf32> to vector<8x1xf32>
    %c0_i32 = arith.constant 0 : i32
    %24 = vector.broadcast %c0_i32 : i32 to vector<8x1xi32>
    %25 = arith.cmpi sge, %15, %24 : vector<8x1xi32>
    %26 = arith.extui %25 : vector<8x1xi1> to vector<8x1xi32>
    %27 = arith.sitofp %26 : vector<8x1xi32> to vector<8x1xf32>
    %28 = arith.subf %14, %23 : vector<8x1xf32>
    %29 = arith.mulf %28, %27 : vector<8x1xf32>
    %30 = vector.shape_cast %29 : vector<8x1xf32> to vector<1x8x1xf32>
    %cst_10 = arith.constant dense<0.000000e+00> : vector<1xf32>
    %31 = vector.multi_reduction <add>, %30, %cst_10 [1, 2] : vector<1x8x1xf32> to vector<1xf32>
    %32 = vector.shape_cast %31 : vector<1xf32> to vector<1x1x1xf32>
    %33 = vector.extract %32[0, 0, 0] : f32 from vector<1x1x1xf32>
    %34 = vector.broadcast %33 : f32 to vector<1x1x128xf32>
    %c0_11 = arith.constant 0 : index
    %c0_12 = arith.constant 0 : index
    %c0_13 = arith.constant 0 : index
    %35 = vector.load %arg5[%c0_11, %c0_12, %c0_13] : memref<1x1x128xf32, #tpu.memory_space<vmem>>, vector<1x1x128xf32>
    tpu.vector_store %arg5[%c0_11, %c0_12, %c0_13], %34 {strides = array<i32>} : memref<1x1x128xf32, #tpu.memory_space<vmem>>, vector<1x1x128xf32>,
    return
  }
  func.func @transform_0(%arg0: i32) -> (i32, i32) {
    %c0_i32 = arith.constant 0 : i32
    %c0_i32_0 = arith.constant 0 : i32
    return %arg0, %c0_i32 : i32, i32
  }
  func.func @transform_1(%arg0: i32) -> (i32, i32) {
    %c0_i32 = arith.constant 0 : i32
    %c0_i32_0 = arith.constant 0 : i32
    %c0_i32_1 = arith.constant 0 : i32
    return %c0_i32, %c0_i32_0 : i32, i32
  }
  func.func @transform_2(%arg0: i32) -> (i32, i32) {
    %c0_i32 = arith.constant 0 : i32
    %c0_i32_0 = arith.constant 0 : i32
    %c0_i32_1 = arith.constant 0 : i32
    return %c0_i32, %c0_i32_0 : i32, i32
  }
  func.func @transform_3(%arg0: i32) -> (i32, i32) {
    %c0_i32 = arith.constant 0 : i32
    %c0_i32_0 = arith.constant 0 : i32
    return %arg0, %c0_i32 : i32, i32
  }
  func.func @transform_4(%arg0: i32) -> (i32, i32, i32) {
    %c0_i32 = arith.constant 0 : i32
    %c0_i32_0 = arith.constant 0 : i32
    %c0_i32_1 = arith.constant 0 : i32
    return %arg0, %c0_i32, %c0_i32_0 : i32, i32, i32
  }
}

</mosaic_0001>

<bundles_post_ra>
// kernel: tpu_custom_call.1
= control target key start
LH: loop header
LB: loop body
LE: loop exit
PB: predicated region body
PF: predicated region fallthrough
CT: control target
= control target key end

     0   :  { %9 = vsyncpa [#allocation3], 0  ;;  %s255_s0 = inlined_call_operand.vmem [shape: bf16[8,32], index: 0, kind: input, shape index: {}]   ;;  %s256_s1 = inlined_call_operand.hbm [shape: bf16[32,128], index: 1, kind: input, shape index: {}]   ;;  %s257_s2 = inlined_call_operand.vmem [shape: f32[1,128], index: 2, kind: input, shape index: {}]   ;;  %s258_s3 = inlined_call_operand.vmem [shape: s32[8,1], index: 3, kind: input, shape index: {}]   ;;  %s259_s4 = inlined_call_operand.hbm [shape: f32[1,1,128], index: 4, kind: output, shape index: {}]  }
   0x1   :  { %10 = vsyncpa [#allocation4], 0  ;;  %s17_s17 = sshll.u32 %s256_s1, 4  ;;  %s209_s18 = smov [#allocation2]   ;;  %s18_s17 = int_to_ptr.hbm [resolvable:$true] %s17_s17 }
   0x2   :  { %s19_s19 = sshll.u32 %s209_s18, 4  ;;  %s210_s20 = smov 64   ;;  %s20_s19 = int_to_ptr.vmem [resolvable:$true] %s19_s19 }
   0x3   :  { %s211_s21 = smov 4  }
   0x4   :  { %25 = dma.hbm_to_vmem [thread:$0]  %s18_s17, 256, %s20_s19, [#allocation3], %s210_s20, %s210_s20, %s211_s21  }
   0x5   :  { %205 = dma.done.wait [#allocation3], 256  }
   0x6   :  { %206 = vsyncadd [#allocation3], 4294967040  ;;  %v142_v0 = vld [vmem:[#allocation2 + $0x8] sm:$0xff]  ;;  %v141_v1 = vld [vmem:[#allocation2] sm:$0xff]  ;;  %vm56_vm0 = vcmask 261120   ;;  %v212_v3 = vmov 0   ;;  %v84_v13 = vlaneseq }
   0x7   :  { %66 = vmatpush.bf16.msra.mxu0 %v142_v0  ;;  %v35_v2 = vld [vmem:[%s255_s0] sm:$0xf]  ;;  %151 = vset.pattern.permute.xlu0 %v212_v3  ;;  %v213_v16 = vmov 0.0   ;;  %vm100_vm3 = vcmask 7168   ;;  %s214_s0 = smov [#allocation5]   ;;  %s120_s28 = sshll.u32 %s259_s4, 4  ;;  %s121_s28 = int_to_ptr.hbm [resolvable:$true] %s120_s28 }
   0x8   :  { %v152_v4 = vld [vmem:[%s257_s2] ss:$0 sm:$0xff]  ;;  %v85_v14 = vand.u32 127, %v84_v13  ;;  %s118_s2 = sshll.u32 %s214_s0, 4  ;;  %s119_s2 = int_to_ptr.vmem [resolvable:$true] %s118_s2 }
   0x9   :  { %v83_v8 = vld [vmem:[%s258_s3] sm:$0xff] }
   0xa   :  { %vm95_vm2 = vcmp.ge.s32.totalorder %v83_v8, 0 }
   0xb   :  { %67 = vmatpush.bf16.msra.mxu0 %v141_v1  ;;  %v140_v24 = vsel %vm95_vm2, 1.0, %v213_v16 }
   0xe   :  { %138 = vmatmul.msk.bf16.vlgmr.msra.gmra.mxu0 %vm56_vm0, %v35_v2 }
  0x8b   :  { %v69_v5 = vpop.f32.mrf.mxu0 }
  0x8c   :  { %v70_v6 = vadd.f32 %v152_v4, %v69_v5 }
  0x8e   :  { %73 = vmax.xlane.f32.xlu0 %v70_v6 }
  0x93   :  { %v71_v7 = vpop.f32.mrf.mxu0 }
  0xa2   :  { %87 = vperm.xlu0 %151, %v83_v8  }
 0x101   :  { %v74_v9 = vpop.xlane.xlu0 %73 }
 0x102   :  { %v75_v10 = vsub.f32 %v70_v6, %v74_v9 }
 0x104   :  { %v76_v11 = vmul.f32 1.442695, %v75_v10 }
 0x106   :  { %153 = vpow2.f32 %v76_v11 }
 0x10c   :  { %v154_v12 = vpop.eup %153 }
 0x10d   :  { %78 = vadd.xlane.f32.xlu1 %v154_v12 }
 0x114   :  { %v88_v15 = vpop.permute.xlu0 %87 }
 0x115   :  { %vm89_vm1 = vcmp.eq.s32.totalorder %v85_v14, %v88_v15 }
 0x116   :  { %v139_v17 = vsel %vm89_vm1, 1.0, %v213_v16 }
 0x117   :  { %v92_v18 = vmul.f32 %v139_v17, %v70_v6 }
 0x119   :  { %93 = vadd.xlane.f32.xlu1 %v92_v18 }
 0x180   :  { %v79_v19 = vpop.xlane.xlu1 %78 }
 0x181   :  { %155 = vlog2.f32 %v79_v19 }
 0x187   :  { %v156_v20 = vpop.eup %155 }
 0x188   :  { %v81_v21 = vmul.f32 0.6931472, %v156_v20 }
 0x18a   :  { %v82_v22 = vadd.f32 %v81_v21, %v74_v9 }
 0x18c   :  { %v94_v23 = vpop.xlane.xlu1 %93 }
 0x18d   :  { %v98_v25 = vsub.f32 %v82_v22, %v94_v23 }
 0x18f   :  { %v99_v26 = vmul.f32 %v140_v24, %v98_v25 }
 0x191   :  { %v101_v27 = vsel %vm100_vm3, %v99_v26, 0.0 }
 0x192   :  { %102 = vadd.xlane.f32.xlu2 %v101_v27 }
 0x205   :  { %v103_v28 = vpop.xlane.xlu2 %102 }
 0x206   :  { %v104_v29 = vrot.slane %v103_v28, 4 }
 0x208   :  { %v105_v30 = vadd.f32 %v104_v29, %v103_v28 }
 0x20a   :  { %v106_v31 = vrot.slane %v105_v30, 2 }
 0x20c   :  { %v107_v32 = vadd.f32 %v106_v31, %v105_v30 }
 0x20e   :  { %v108_v33 = vrot.slane %v107_v32, 1 }
 0x210   :  { %v109_v34 = vadd.f32 %v108_v33, %v107_v32 }
 0x212   :  { %143 = vpush %v109_v34 }
 0x243   :  { %s144_s29 = spop %143 }
 0x244   :  { %v111_v35 = vstv %s144_s29 }
 0x245   :  { %112 = vst [vmem:[#allocation5] sm:$0x1] %v111_v35 }
 0x246   :  { %123 = dma.vmem_to_hbm [thread:$0]  %s119_s2, 16, %s121_s28, [#allocation4]  }
 0x247   :  { %207 = dma.done.wait [#allocation4], 16  }
 0x248   :  { %208 = vsyncadd [#allocation4], 4294967280 }
 0x249   :  { %128 = vsyncpa [#allocation3], 1 }
 0x24a   :  { %129 = vsyncpa [#allocation4], 1 }

</bundles_post_ra>
